<compile_context>
chip_gen: v7x
topology: tpu7x:2x2x1
jax: 0.10.0
libtpu: 0.0.40
codegen_flags: <defaults>
</compile_context>

<pallas_src>
import functools

import jax
import jax.numpy as jnp
from jax import lax
from jax.experimental import pallas as pl
from jax.experimental.pallas import tpu as pltpu

_EPS = 1e-5  # nn.LayerNorm default


def _prenorm_residual_kernel(x_ref, *rest, col_tiled: bool):
    """Computes one (block_rows, block_cols) output tile.

    x_ref        : (bm, D)  full-width row tile (LayerNorm needs the full row).
    xr_ref       : (bm, bn) column slice of x for the residual (col-tiled only).
    gamma, beta  : (1, D)   LayerNorm affine params (f32).
    w_ref        : (D, bn)  weight tile, pre-transposed to (in, out), bf16.
    b_ref        : (1, bn)  Linear bias tile (f32).
    o_ref        : (bm, bn) output tile.
    """
    if col_tiled:
        xr_ref, gamma_ref, beta_ref, w_ref, b_ref, o_ref = rest
    else:
        gamma_ref, beta_ref, w_ref, b_ref, o_ref = rest
        xr_ref = None

    x = x_ref[...].astype(jnp.float32)
    resid = x if xr_ref is None else xr_ref[...].astype(jnp.float32)

    # --- LayerNorm over last dim (biased variance, eps inside rsqrt, affine) ---
    mean = jnp.mean(x, axis=-1, keepdims=True)
    centered = x - mean
    var = jnp.mean(centered * centered, axis=-1, keepdims=True)
    xn = centered * lax.rsqrt(var + _EPS)          # rsqrt lives on the EUP slot
    h = xn * gamma_ref[...].astype(jnp.float32) + beta_ref[...].astype(jnp.float32)

    # --- fn == Linear: h @ W^T + b.  bf16 MXU inputs, f32 accumulation. ---
    y = jnp.dot(h.astype(w_ref.dtype), w_ref[...],
                preferred_element_type=jnp.float32)
    y = y + b_ref[...].astype(jnp.float32)

    # --- residual with the *pre-norm* x; single fused store ---
    o_ref[...] = (y + resid).astype(o_ref.dtype)


@functools.partial(jax.jit, static_argnames=("block_rows", "block_cols"))
def prenorm_residual(x, gamma, beta, weight, bias, *,
                     block_rows=256, block_cols=None):
    """fn(LayerNorm(x)) + x with fn = nn.Linear(dim, dim).

    Args:
      x:      (B, N, D) activations.
      gamma:  (D,) LayerNorm weight.
      beta:   (D,) LayerNorm bias.
      weight: (D, D) Linear weight in *PyTorch layout* (out_features, in_features);
              transposed + cast to bf16 once here before the kernel.
      bias:   (D,) Linear bias.
      block_rows: rows per tile (multiple of 8; 256-1024 recommended).
      block_cols: output-column tile; None -> full D (or 512 when D > 1024).
    """
    B, N, D = x.shape
    rows = B * N

    if block_cols is None:
        block_cols = D if D <= 1024 else 512
    assert D % block_cols == 0, "block_cols must divide D"
    assert block_cols == D or block_cols % 128 == 0, "column tile must be lane-dense"
    assert block_rows % 8 == 0, "block_rows must be a multiple of 8"

    n_row = pl.cdiv(rows, block_rows)
    n_col = D // block_cols
    rows_padded = n_row * block_rows

    x2 = x.reshape(rows, D)
    if rows_padded != rows:
        # Padded rows go through LayerNorm (var=0 -> xn=0, finite) and are
        # sliced off after the call.
        x2 = jnp.pad(x2, ((0, rows_padded - rows), (0, 0)))

    gamma2 = gamma.reshape(1, D).astype(jnp.float32)
    beta2 = beta.reshape(1, D).astype(jnp.float32)
    bias2 = bias.reshape(1, D).astype(jnp.float32)
    # PyTorch Linear: y = h @ W.T + b with W (out, in).  Transpose once and
    # cast to bf16 (native MXU input dtype); accumulation stays f32.
    w_t = weight.T.astype(jnp.bfloat16)

    col_tiled = n_col > 1
    kernel = functools.partial(_prenorm_residual_kernel, col_tiled=col_tiled)

    in_specs = [pl.BlockSpec((block_rows, D), lambda i, j: (i, 0))]   # x (full row)
    operands = [x2]
    if col_tiled:
        # Column slice of x for the residual (avoids dynamic lane slicing).
        in_specs.append(pl.BlockSpec((block_rows, block_cols), lambda i, j: (i, j)))
        operands.append(x2)
    in_specs += [
        pl.BlockSpec((1, D), lambda i, j: (0, 0)),             # gamma
        pl.BlockSpec((1, D), lambda i, j: (0, 0)),             # beta
        pl.BlockSpec((D, block_cols), lambda i, j: (0, j)),    # W^T (bf16)
        pl.BlockSpec((1, block_cols), lambda i, j: (0, j)),    # bias
    ]
    operands += [gamma2, beta2, w_t, bias2]

    itemsize = x2.dtype.itemsize
    bytes_accessed = int(
        rows_padded * D * itemsize * (2 if col_tiled else 1)   # x (LN + residual)
        + rows_padded * D * itemsize                           # output
        + n_row * D * D * 2                                    # bf16 weight per row tile
        + 3 * D * 4)                                           # gamma/beta/bias
    cost = pl.CostEstimate(
        flops=int(2 * rows_padded * D * D + 8 * rows_padded * D),
        transcendentals=int(rows_padded),                      # one rsqrt per row
        bytes_accessed=bytes_accessed)

    out2 = pl.pallas_call(
        kernel,
        out_shape=jax.ShapeDtypeStruct((rows_padded, D), x.dtype),
        grid_spec=pltpu.PrefetchScalarGridSpec(
            num_scalar_prefetch=0,
            grid=(n_row, n_col),
            in_specs=in_specs,
            out_specs=pl.BlockSpec((block_rows, block_cols), lambda i, j: (i, j)),
        ),
        compiler_params=pltpu.CompilerParams(
            dimension_semantics=("parallel", "parallel")),
        cost_estimate=cost,
    )(*operands)

    return out2[:rows].reshape(B, N, D)


def _reference(x, gamma, beta, weight, bias):
    """Pure-JAX reference matching the kernel's numerics (bf16 matmul, f32 acc)."""
    mean = jnp.mean(x, axis=-1, keepdims=True)
    var = jnp.mean((x - mean) ** 2, axis=-1, keepdims=True)
    xn = (x - mean) * lax.rsqrt(var + _EPS)
    h = xn * gamma + beta
    y = jnp.dot(h.astype(jnp.bfloat16), weight.T.astype(jnp.bfloat16),
                preferred_element_type=jnp.float32)
    return y + bias + x


if __name__ == "__main__":
    key = jax.random.PRNGKey(0)
    k1, k2, k3, k4 = jax.random.split(key, 4)

    # --- small shapes consistent with the module: batch=2, seq=8, dim=32 ---
    B, N, D = 2, 8, 32
    x = jax.random.normal(k1, (B, N, D), dtype=jnp.float32)
    gamma = jnp.ones((D,), jnp.float32)                 # LayerNorm weight init
    beta = jnp.zeros((D,), jnp.float32)                 # LayerNorm bias init
    weight = jax.random.normal(k2, (D, D), dtype=jnp.float32) * 0.02  # PyTorch (out,in)
    bias = jax.random.normal(k3, (D,), dtype=jnp.float32) * 0.02

    out = prenorm_residual(x, gamma, beta, weight, bias, block_rows=256)
    out = jax.block_until_ready(out)
    ref = _reference(x, gamma, beta, weight, bias)
    assert out.shape == (B, N, D)
    assert jnp.allclose(out, ref, atol=1e-3, rtol=1e-3), "mismatch vs reference (demo)"

    # --- second check: ragged row count + column-tiled weight path ---
    B2, N2, D2 = 2, 10, 256        # rows=20 (needs padding), 2 column tiles of 128
    x_b = jax.random.normal(k4, (B2, N2, D2), dtype=jnp.float32)
    gamma_b = jnp.ones((D2,), jnp.float32)
    beta_b = jnp.zeros((D2,), jnp.float32)
    w_b = jax.random.normal(k2, (D2, D2), dtype=jnp.float32) * 0.02
    b_b = jax.random.normal(k3, (D2,), dtype=jnp.float32) * 0.02

    out_b = prenorm_residual(x_b, gamma_b, beta_b, w_b, b_b,
                             block_rows=128, block_cols=128)
    out_b = jax.block_until_ready(out_b)
    ref_b = _reference(x_b, gamma_b, beta_b, w_b, b_b)
    assert out_b.shape == (B2, N2, D2)
    assert jnp.allclose(out_b, ref_b, atol=2e-3, rtol=2e-3), "mismatch vs reference (tiled)"

    print("KERNEL_OK")
</pallas_src>

<mosaic_0001>
module attributes {stable_mosaic.version = 11 : i64} {
  func.func @_prenorm_residual_kernel(%arg0: i32, %arg1: i32, %arg2: memref<256x32xf32, #tpu.memory_space<vmem>>, %arg3: memref<1x32xf32, #tpu.memory_space<vmem>>, %arg4: memref<1x32xf32, #tpu.memory_space<vmem>>, %arg5: memref<32x32xbf16, #tpu.memory_space<vmem>>, %arg6: memref<1x32xf32, #tpu.memory_space<vmem>>, %arg7: memref<256x32xf32, #tpu.memory_space<vmem>>) attributes {dimension_semantics = [#tpu.dimension_semantics<parallel>, #tpu.dimension_semantics<parallel>], iteration_bounds = array<i64: 1, 1>, scalar_prefetch = 0 : i64, scratch_operands = 0 : i64, tpu.core_type = #tpu.core_type<tc>, window_params = [{transform_indices = @transform_0, window_bounds = array<i64: 256, 32>}, {pipeline_mode = #tpu.pipeline_mode<synchronous>, transform_indices = @transform_1, window_bounds = array<i64: 1, 32>}, {pipeline_mode = #tpu.pipeline_mode<synchronous>, transform_indices = @transform_2, window_bounds = array<i64: 1, 32>}, {transform_indices = @transform_3, window_bounds = array<i64: 32, 32>}, {transform_indices = @transform_4, window_bounds = array<i64: 1, 32>}, {transform_indices = @transform_5, window_bounds = array<i64: 256, 32>}]} {
    %c0 = arith.constant 0 : index
    %c0_0 = arith.constant 0 : index
    %0 = vector.load %arg2[%c0, %c0_0] : memref<256x32xf32, #tpu.memory_space<vmem>>, vector<256x32xf32>
    %cst = arith.constant dense<0.000000e+00> : vector<256xf32>
    %1 = vector.multi_reduction <add>, %0, %cst [1] : vector<256x32xf32> to vector<256xf32>
    %2 = vector.shape_cast %1 : vector<256xf32> to vector<256x1xf32>
    %cst_1 = arith.constant 3.200000e+01 : f32
    %3 = vector.broadcast %cst_1 : f32 to vector<256x1xf32>
    %4 = arith.divf %2, %3 : vector<256x1xf32>
    %5 = vector.broadcast %4 : vector<256x1xf32> to vector<256x32xf32>
    %6 = arith.subf %0, %5 : vector<256x32xf32>
    %7 = arith.mulf %6, %6 : vector<256x32xf32>
    %cst_2 = arith.constant dense<0.000000e+00> : vector<256xf32>
    %8 = vector.multi_reduction <add>, %7, %cst_2 [1] : vector<256x32xf32> to vector<256xf32>
    %9 = vector.shape_cast %8 : vector<256xf32> to vector<256x1xf32>
    %cst_3 = arith.constant 3.200000e+01 : f32
    %10 = vector.broadcast %cst_3 : f32 to vector<256x1xf32>
    %11 = arith.divf %9, %10 : vector<256x1xf32>
    %cst_4 = arith.constant 9.99999974E-6 : f32
    %12 = vector.broadcast %cst_4 : f32 to vector<256x1xf32>
    %13 = arith.addf %11, %12 : vector<256x1xf32>
    %14 = math.rsqrt %13 : vector<256x1xf32>
    %15 = vector.broadcast %14 : vector<256x1xf32> to vector<256x32xf32>
    %16 = arith.mulf %6, %15 : vector<256x32xf32>
    %c0_5 = arith.constant 0 : index
    %c0_6 = arith.constant 0 : index
    %17 = vector.load %arg3[%c0_5, %c0_6] : memref<1x32xf32, #tpu.memory_space<vmem>>, vector<1x32xf32>
    %18 = vector.broadcast %17 : vector<1x32xf32> to vector<256x32xf32>
    %19 = arith.mulf %16, %18 : vector<256x32xf32>
    %c0_7 = arith.constant 0 : index
    %c0_8 = arith.constant 0 : index
    %20 = vector.load %arg4[%c0_7, %c0_8] : memref<1x32xf32, #tpu.memory_space<vmem>>, vector<1x32xf32>
    %21 = vector.broadcast %20 : vector<1x32xf32> to vector<256x32xf32>
    %22 = arith.addf %19, %21 : vector<256x32xf32>
    %23 = arith.truncf %22 : vector<256x32xf32> to vector<256x32xbf16>
    %c0_9 = arith.constant 0 : index
    %c0_10 = arith.constant 0 : index
    %24 = vector.load %arg5[%c0_9, %c0_10] : memref<32x32xbf16, #tpu.memory_space<vmem>>, vector<32x32xbf16>
    %cst_11 = arith.constant dense<0.000000e+00> : vector<256x32xf32>
    %25 = tpu.matmul %23, %24, %cst_11 {dimension_numbers = #tpu.dot_dimension_numbers<[1], [0], [0], [1], [0, 0, 1, 1], [], []>} : vector<256x32xbf16>, vector<32x32xbf16>, vector<256x32xf32> -> vector<256x32xf32>
    %c0_12 = arith.constant 0 : index
    %c0_13 = arith.constant 0 : index
    %26 = vector.load %arg6[%c0_12, %c0_13] : memref<1x32xf32, #tpu.memory_space<vmem>>, vector<1x32xf32>
    %27 = vector.broadcast %26 : vector<1x32xf32> to vector<256x32xf32>
    %28 = arith.addf %25, %27 : vector<256x32xf32>
    %29 = arith.addf %28, %0 : vector<256x32xf32>
    %c0_14 = arith.constant 0 : index
    %c0_15 = arith.constant 0 : index
    %30 = vector.load %arg7[%c0_14, %c0_15] : memref<256x32xf32, #tpu.memory_space<vmem>>, vector<256x32xf32>
    tpu.vector_store %arg7[%c0_14, %c0_15], %29 {strides = array<i32>} : memref<256x32xf32, #tpu.memory_space<vmem>>, vector<256x32xf32>,
    return
  }
  func.func @transform_0(%arg0: i32, %arg1: i32) -> (i32, i32) {
    %c0_i32 = arith.constant 0 : i32
    %c0_i32_0 = arith.constant 0 : i32
    return %arg0, %c0_i32 : i32, i32
  }
  func.func @transform_1(%arg0: i32, %arg1: i32) -> (i32, i32) {
    %c0_i32 = arith.constant 0 : i32
    %c0_i32_0 = arith.constant 0 : i32
    %c0_i32_1 = arith.constant 0 : i32
    return %c0_i32, %c0_i32_0 : i32, i32
  }
  func.func @transform_2(%arg0: i32, %arg1: i32) -> (i32, i32) {
    %c0_i32 = arith.constant 0 : i32
    %c0_i32_0 = arith.constant 0 : i32
    %c0_i32_1 = arith.constant 0 : i32
    return %c0_i32, %c0_i32_0 : i32, i32
  }
  func.func @transform_3(%arg0: i32, %arg1: i32) -> (i32, i32) {
    %c0_i32 = arith.constant 0 : i32
    %c0_i32_0 = arith.constant 0 : i32
    return %c0_i32, %arg1 : i32, i32
  }
  func.func @transform_4(%arg0: i32, %arg1: i32) -> (i32, i32) {
    %c0_i32 = arith.constant 0 : i32
    %c0_i32_0 = arith.constant 0 : i32
    return %c0_i32, %arg1 : i32, i32
  }
  func.func @transform_5(%arg0: i32, %arg1: i32) -> (i32, i32) {
    %c0_i32 = arith.constant 0 : i32
    return %arg0, %arg1 : i32, i32
  }
}

</mosaic_0001>

<bundles_post_ra>
// kernel: prenorm_residual.1
= control target key start
LH: loop header
LB: loop body
LE: loop exit
PB: predicated region body
PF: predicated region fallthrough
CT: control target
= control target key end

     0   :  { %vm53_vm0 = vcmask 261120   ;;  %s1877_s0 = inlined_call_operand.vmem [shape: f32[256,32], index: 0, kind: input, shape index: {}]   ;;  %s1878_s3 = inlined_call_operand.vmem [shape: bf16[32,32], index: 3, kind: input, shape index: {}]   ;;  %s1879_s1 = inlined_call_operand.vmem [shape: f32[1,32], index: 1, kind: input, shape index: {}]   ;;  %s1880_s2 = inlined_call_operand.vmem [shape: f32[1,32], index: 2, kind: input, shape index: {}]   ;;  %s1881_s4 = inlined_call_operand.vmem [shape: f32[1,32], index: 4, kind: input, shape index: {}]   ;;  %s1882_s5 = inlined_call_operand.vmem [shape: f32[256,32], index: 5, kind: output, shape index: {}]  }
   0x1   :  { %v1075_v0 = vld [vmem:[%s1877_s0] sm:$0xff]  ;;  %v1085_v2 = vld [vmem:[%s1877_s0 + $0x8] sm:$0xff]  ;;  %v1103_v8 = vld [vmem:[%s1877_s0 + $0x10] sm:$0xff] }
   0x2   :  { %v1080_v1 = vld [vmem:[%s1877_s0 + $0x80] sm:$0xff]  ;;  %v54_v3 = vsel %vm53_vm0, %v1075_v0, 0.0  ;;  %v1094_v5 = vld [vmem:[%s1877_s0 + $0x88] sm:$0xff]  ;;  %v57_v6 = vsel %vm53_vm0, %v1085_v2, 0.0  ;;  %v1108_v9 = vld [vmem:[%s1877_s0 + $0x18] sm:$0xff]  ;;  %v60_v10 = vsel %vm53_vm0, %v1103_v8, 0.0 }
   0x3   :  { %v102_v4 = vsel %vm53_vm0, %v1080_v1, 0.0  ;;  %55 = vadd.xlane.f32.xlu0 %v54_v3  ;;  %v105_v7 = vsel %vm53_vm0, %v1094_v5, 0.0  ;;  %v63_v11 = vsel %vm53_vm0, %v1108_v9, 0.0  ;;  %v1117_v12 = vld [vmem:[%s1877_s0 + $0x90] sm:$0xff]  ;;  %v1122_v13 = vld [vmem:[%s1877_s0 + $0x98] sm:$0xff]  ;;  %v1131_v16 = vld [vmem:[%s1877_s0 + $0x20] sm:$0xff] }
   0x4   :  { %103 = vadd.xlane.f32.xlu1 %v102_v4  ;;  %v108_v14 = vsel %vm53_vm0, %v1117_v12, 0.0  ;;  %v111_v15 = vsel %vm53_vm0, %v1122_v13, 0.0  ;;  %v1136_v17 = vld [vmem:[%s1877_s0 + $0x28] sm:$0xff]  ;;  %v66_v18 = vsel %vm53_vm0, %v1131_v16, 0.0  ;;  %v1145_v20 = vld [vmem:[%s1877_s0 + $0xa0] sm:$0xff]  ;;  %v1159_v24 = vld [vmem:[%s1877_s0 + $0x30] sm:$0xff] }
   0x5   :  { %v69_v19 = vsel %vm53_vm0, %v1136_v17, 0.0  ;;  %v1150_v21 = vld [vmem:[%s1877_s0 + $0xa8] sm:$0xff]  ;;  %v114_v22 = vsel %vm53_vm0, %v1145_v20, 0.0  ;;  %v1164_v25 = vld [vmem:[%s1877_s0 + $0x38] sm:$0xff]  ;;  %v72_v26 = vsel %vm53_vm0, %v1159_v24, 0.0  ;;  %v1173_v28 = vld [vmem:[%s1877_s0 + $0xb0] sm:$0xff] }
   0x6   :  { %v117_v23 = vsel %vm53_vm0, %v1150_v21, 0.0  ;;  %v75_v27 = vsel %vm53_vm0, %v1164_v25, 0.0  ;;  %v1178_v29 = vld [vmem:[%s1877_s0 + $0xb8] sm:$0xff]  ;;  %v120_v30 = vsel %vm53_vm0, %v1173_v28, 0.0  ;;  %v1187_v32 = vld [vmem:[%s1877_s0 + $0x40] sm:$0xff]  ;;  %v1192_v33 = vld [vmem:[%s1877_s0 + $0x48] sm:$0xff] }
   0x7   :  { %58 = vadd.xlane.f32.xlu0 %v57_v6  ;;  %v123_v31 = vsel %vm53_vm0, %v1178_v29, 0.0  ;;  %v78_v34 = vsel %vm53_vm0, %v1187_v32, 0.0  ;;  %v81_v35 = vsel %vm53_vm0, %v1192_v33, 0.0  ;;  %v1201_v36 = vld [vmem:[%s1877_s0 + $0xc0] sm:$0xff]  ;;  %v1206_v37 = vld [vmem:[%s1877_s0 + $0xc8] sm:$0xff]  ;;  %v1215_v40 = vld [vmem:[%s1877_s0 + $0x50] sm:$0xff] }
   0x8   :  { %106 = vadd.xlane.f32.xlu1 %v105_v7  ;;  %v126_v38 = vsel %vm53_vm0, %v1201_v36, 0.0  ;;  %v129_v39 = vsel %vm53_vm0, %v1206_v37, 0.0  ;;  %v1220_v41 = vld [vmem:[%s1877_s0 + $0x58] sm:$0xff]  ;;  %v84_v42 = vsel %vm53_vm0, %v1215_v40, 0.0  ;;  %v1229_v44 = vld [vmem:[%s1877_s0 + $0xd0] sm:$0xff]  ;;  %v1243_v48 = vld [vmem:[%s1877_s0 + $0x60] sm:$0xff] }
   0x9   :  { %v87_v43 = vsel %vm53_vm0, %v1220_v41, 0.0  ;;  %v1234_v45 = vld [vmem:[%s1877_s0 + $0xd8] sm:$0xff]  ;;  %v132_v46 = vsel %vm53_vm0, %v1229_v44, 0.0  ;;  %v1248_v49 = vld [vmem:[%s1877_s0 + $0x68] sm:$0xff]  ;;  %v90_v50 = vsel %vm53_vm0, %v1243_v48, 0.0  ;;  %v1257_v52 = vld [vmem:[%s1877_s0 + $0xe0] sm:$0xff] }
   0xa   :  { %v135_v47 = vsel %vm53_vm0, %v1234_v45, 0.0  ;;  %v93_v51 = vsel %vm53_vm0, %v1248_v49, 0.0  ;;  %v1262_v53 = vld [vmem:[%s1877_s0 + $0xe8] sm:$0xff]  ;;  %v138_v54 = vsel %vm53_vm0, %v1257_v52, 0.0  ;;  %v1271_v56 = vld [vmem:[%s1877_s0 + $0x70] sm:$0xff]  ;;  %v1276_v57 = vld [vmem:[%s1877_s0 + $0x78] sm:$0xff] }
   0xb   :  { %61 = vadd.xlane.f32.xlu0 %v60_v10  ;;  %v141_v55 = vsel %vm53_vm0, %v1262_v53, 0.0  ;;  %v96_v58 = vsel %vm53_vm0, %v1271_v56, 0.0  ;;  %v99_v59 = vsel %vm53_vm0, %v1276_v57, 0.0  ;;  %v1285_v60 = vld [vmem:[%s1877_s0 + $0xf0] sm:$0xff]  ;;  %v1290_v61 = vld [vmem:[%s1877_s0 + $0xf8] sm:$0xff] }
   0xc   :  { %64 = vadd.xlane.f32.xlu1 %v63_v11  ;;  %v144_v62 = vsel %vm53_vm0, %v1285_v60, 0.0  ;;  %v147_v63 = vsel %vm53_vm0, %v1290_v61, 0.0 }
   0xf   :  { %109 = vadd.xlane.f32.xlu0 %v108_v14 }
  0x10   :  { %112 = vadd.xlane.f32.xlu1 %v111_v15 }
  0x13   :  { %67 = vadd.xlane.f32.xlu0 %v66_v18 }
  0x14   :  { %70 = vadd.xlane.f32.xlu1 %v69_v19 }
  0x17   :  { %115 = vadd.xlane.f32.xlu0 %v114_v22 }
  0x18   :  { %118 = vadd.xlane.f32.xlu1 %v117_v23 }
  0x1b   :  { %73 = vadd.xlane.f32.xlu0 %v72_v26 }
  0x1c   :  { %76 = vadd.xlane.f32.xlu1 %v75_v27 }
  0x1f   :  { %121 = vadd.xlane.f32.xlu0 %v120_v30 }
  0x20   :  { %124 = vadd.xlane.f32.xlu1 %v123_v31 }
  0x23   :  { %79 = vadd.xlane.f32.xlu0 %v78_v34 }
  0x24   :  { %82 = vadd.xlane.f32.xlu1 %v81_v35 }
  0x27   :  { %127 = vadd.xlane.f32.xlu0 %v126_v38 }
  0x28   :  { %130 = vadd.xlane.f32.xlu1 %v129_v39 }
  0x2b   :  { %85 = vadd.xlane.f32.xlu0 %v84_v42 }
  0x2c   :  { %88 = vadd.xlane.f32.xlu1 %v87_v43 }
  0x2f   :  { %133 = vadd.xlane.f32.xlu0 %v132_v46 }
  0x30   :  { %136 = vadd.xlane.f32.xlu1 %v135_v47 }
  0x33   :  { %91 = vadd.xlane.f32.xlu0 %v90_v50 }
  0x34   :  { %94 = vadd.xlane.f32.xlu1 %v93_v51 }
  0x37   :  { %139 = vadd.xlane.f32.xlu0 %v138_v54 }
  0x38   :  { %142 = vadd.xlane.f32.xlu1 %v141_v55 }
  0x3b   :  { %97 = vadd.xlane.f32.xlu0 %v96_v58 }
  0x3c   :  { %100 = vadd.xlane.f32.xlu1 %v99_v59 }
  0x3f   :  { %145 = vadd.xlane.f32.xlu0 %v144_v62 }
  0x40   :  { %148 = vadd.xlane.f32.xlu1 %v147_v63 }
  0x90   :  { %v56_v3 = vpop.xlane.xlu0 %55 }
  0x91   :  { %v104_v4 = vpop.xlane.xlu1 %103  ;;  %v151_v6 = vmul.f32 0.03125, %v56_v3 }
  0x92   :  { %v167_v7 = vmul.f32 0.03125, %v104_v4 }
  0x93   :  { %v1297_v10 = vsub.f32 %v1075_v0, %v151_v6 }
  0x94   :  { %v1300_v11 = vsub.f32 %v1080_v1, %v167_v7  ;;  %v59_v14 = vpop.xlane.xlu0 %58 }
  0x95   :  { %v107_v15 = vpop.xlane.xlu1 %106  ;;  %v152_v18 = vmul.f32 0.03125, %v59_v14  ;;  %v215_v22 = vmul.f32 %v1297_v10, %v1297_v10 }
  0x96   :  { %v168_v19 = vmul.f32 0.03125, %v107_v15  ;;  %v231_v23 = vmul.f32 %v1300_v11, %v1300_v11 }
  0x97   :  { %v1307_v26 = vsub.f32 %v1085_v2, %v152_v18  ;;  %v247_v0 = vsel %vm53_vm0, %v215_v22, 0.0 }
  0x98   :  { %v1310_v27 = vsub.f32 %v1094_v5, %v168_v19  ;;  %248 = vadd.xlane.f32.xlu0 %v247_v0  ;;  %v62_v1 = vpop.xlane.xlu0 %61  ;;  %v295_v31 = vsel %vm53_vm0, %v231_v23, 0.0 }
  0x99   :  { %v65_v30 = vpop.xlane.xlu1 %64  ;;  %v153_v34 = vmul.f32 0.03125, %v62_v1  ;;  %v216_v38 = vmul.f32 %v1307_v26, %v1307_v26 }
  0x9a   :  { %v154_v35 = vmul.f32 0.03125, %v65_v30  ;;  %v232_v39 = vmul.f32 %v1310_v27, %v1310_v27 }
  0x9b   :  { %v1319_v2 = vsub.f32 %v1103_v8, %v153_v34  ;;  %v250_v42 = vsel %vm53_vm0, %v216_v38, 0.0 }
  0x9c   :  { %v1322_v5 = vsub.f32 %v1108_v9, %v154_v35  ;;  %296 = vadd.xlane.f32.xlu0 %v295_v31  ;;  %251 = vadd.xlane.f32.xlu1 %v250_v42  ;;  %v110_v43 = vpop.xlane.xlu0 %109  ;;  %v298_v47 = vsel %vm53_vm0, %v232_v39, 0.0 }
  0x9d   :  { %v113_v46 = vpop.xlane.xlu1 %112  ;;  %v169_v50 = vmul.f32 0.03125, %v110_v43  ;;  %v217_v54 = vmul.f32 %v1319_v2, %v1319_v2 }
  0x9e   :  { %v170_v51 = vmul.f32 0.03125, %v113_v46  ;;  %v218_v8 = vmul.f32 %v1322_v5, %v1322_v5 }
  0x9f   :  { %v1331_v55 = vsub.f32 %v1117_v12, %v169_v50  ;;  %v253_v58 = vsel %vm53_vm0, %v217_v54, 0.0 }
  0xa0   :  { %v1334_v9 = vsub.f32 %v1122_v13, %v170_v51  ;;  %299 = vadd.xlane.f32.xlu1 %v298_v47  ;;  %254 = vadd.xlane.f32.xlu0 %v253_v58  ;;  %v68_v59 = vpop.xlane.xlu0 %67  ;;  %v256_v63 = vsel %vm53_vm0, %v218_v8, 0.0 }
  0xa1   :  { %v71_v62 = vpop.xlane.xlu1 %70  ;;  %v155_v3 = vmul.f32 0.03125, %v68_v59  ;;  %v233_v6 = vmul.f32 %v1331_v55, %v1331_v55 }
  0xa2   :  { %v156_v4 = vmul.f32 0.03125, %v71_v62  ;;  %v234_v12 = vmul.f32 %v1334_v9, %v1334_v9 }
  0xa3   :  { %v1343_v7 = vsub.f32 %v1131_v16, %v155_v3  ;;  %v301_v14 = vsel %vm53_vm0, %v233_v6, 0.0 }
  0xa4   :  { %v1346_v13 = vsub.f32 %v1136_v17, %v156_v4  ;;  %257 = vadd.xlane.f32.xlu1 %v256_v63  ;;  %302 = vadd.xlane.f32.xlu0 %v301_v14  ;;  %v116_v15 = vpop.xlane.xlu0 %115  ;;  %v304_v19 = vsel %vm53_vm0, %v234_v12, 0.0 }
  0xa5   :  { %v119_v18 = vpop.xlane.xlu1 %118  ;;  %v171_v22 = vmul.f32 0.03125, %v116_v15  ;;  %v219_v0 = vmul.f32 %v1343_v7, %v1343_v7 }
  0xa6   :  { %v172_v23 = vmul.f32 0.03125, %v119_v18  ;;  %v220_v16 = vmul.f32 %v1346_v13, %v1346_v13 }
  0xa7   :  { %v1355_v1 = vsub.f32 %v1145_v20, %v171_v22  ;;  %v259_v30 = vsel %vm53_vm0, %v219_v0, 0.0 }
  0xa8   :  { %v1358_v17 = vsub.f32 %v1150_v21, %v172_v23  ;;  %305 = vadd.xlane.f32.xlu1 %v304_v19  ;;  %260 = vadd.xlane.f32.xlu0 %v259_v30  ;;  %v74_v31 = vpop.xlane.xlu0 %73  ;;  %v262_v35 = vsel %vm53_vm0, %v220_v16, 0.0 }
  0xa9   :  { %v77_v34 = vpop.xlane.xlu1 %76  ;;  %v157_v38 = vmul.f32 0.03125, %v74_v31  ;;  %v235_v42 = vmul.f32 %v1355_v1, %v1355_v1 }
  0xaa   :  { %v158_v39 = vmul.f32 0.03125, %v77_v34  ;;  %v236_v20 = vmul.f32 %v1358_v17, %v1358_v17 }
  0xab   :  { %v1367_v43 = vsub.f32 %v1159_v24, %v157_v38  ;;  %v307_v46 = vsel %vm53_vm0, %v235_v42, 0.0 }
  0xac   :  { %v1370_v21 = vsub.f32 %v1164_v25, %v158_v39  ;;  %263 = vadd.xlane.f32.xlu1 %v262_v35  ;;  %308 = vadd.xlane.f32.xlu0 %v307_v46  ;;  %v122_v47 = vpop.xlane.xlu0 %121  ;;  %v310_v51 = vsel %vm53_vm0, %v236_v20, 0.0 }
  0xad   :  { %v125_v50 = vpop.xlane.xlu1 %124  ;;  %v173_v54 = vmul.f32 0.03125, %v122_v47  ;;  %v221_v58 = vmul.f32 %v1367_v43, %v1367_v43 }
  0xae   :  { %v174_v8 = vmul.f32 0.03125, %v125_v50  ;;  %v222_v24 = vmul.f32 %v1370_v21, %v1370_v21 }
  0xaf   :  { %v1379_v59 = vsub.f32 %v1173_v28, %v173_v54  ;;  %v265_v62 = vsel %vm53_vm0, %v221_v58, 0.0 }
  0xb0   :  { %v1382_v25 = vsub.f32 %v1178_v29, %v174_v8  ;;  %311 = vadd.xlane.f32.xlu1 %v310_v51  ;;  %266 = vadd.xlane.f32.xlu0 %v265_v62  ;;  %v80_v63 = vpop.xlane.xlu0 %79  ;;  %v268_v4 = vsel %vm53_vm0, %v222_v24, 0.0 }
  0xb1   :  { %v83_v3 = vpop.xlane.xlu1 %82  ;;  %v159_v6 = vmul.f32 0.03125, %v80_v63  ;;  %v237_v14 = vmul.f32 %v1379_v59, %v1379_v59 }
  0xb2   :  { %v160_v12 = vmul.f32 0.03125, %v83_v3  ;;  %v238_v28 = vmul.f32 %v1382_v25, %v1382_v25 }
  0xb3   :  { %v1391_v15 = vsub.f32 %v1187_v32, %v159_v6  ;;  %v313_v18 = vsel %vm53_vm0, %v237_v14, 0.0  ;;  %v944_v14 = vld [vmem:[%s1878_s3] sm:$0xff]  }
  0xb4   :  { %v1394_v29 = vsub.f32 %v1192_v33, %v160_v12  ;;  %269 = vadd.xlane.f32.xlu1 %v268_v4  ;;  %314 = vadd.xlane.f32.xlu0 %v313_v18  ;;  %v128_v19 = vpop.xlane.xlu0 %127  ;;  %v316_v23 = vsel %vm53_vm0, %v238_v28, 0.0 }
  0xb5   :  { %v131_v22 = vpop.xlane.xlu1 %130  ;;  %v175_v0 = vmul.f32 0.03125, %v128_v19  ;;  %v223_v30 = vmul.f32 %v1391_v15, %v1391_v15  ;;  %904 = vmatprep.subr.bf16.mxu0 %v944_v14  ;;  %940 = vmatprep.subr.bf16.mxu1 %v944_v14 }
  0xb6   :  { %v176_v16 = vmul.f32 0.03125, %v131_v22  ;;  %v224_v32 = vmul.f32 %v1394_v29, %v1394_v29  ;;  %905 = vmatpush3.bf16.msra.mxu0 %v944_v14  ;;  %942 = vmatpush3.bf16.msra.mxu1 %v944_v14 }
  0xb7   :  { %v1403_v31 = vsub.f32 %v1201_v36, %v175_v0  ;;  %v271_v34 = vsel %vm53_vm0, %v223_v30, 0.0 }
  0xb8   :  { %v1406_v33 = vsub.f32 %v1206_v37, %v176_v16  ;;  %317 = vadd.xlane.f32.xlu1 %v316_v23  ;;  %272 = vadd.xlane.f32.xlu0 %v271_v34  ;;  %v86_v35 = vpop.xlane.xlu0 %85  ;;  %v274_v39 = vsel %vm53_vm0, %v224_v32, 0.0  ;;  %v945_v32 = vld [vmem:[%s1878_s3 + $0x8] sm:$0xff]  }
  0xb9   :  { %v89_v38 = vpop.xlane.xlu1 %88  ;;  %v161_v42 = vmul.f32 0.03125, %v86_v35  ;;  %v239_v46 = vmul.f32 %v1403_v31, %v1403_v31  ;;  %906 = vmatprep.subr.bf16.mxu0 %v945_v32  ;;  %941 = vmatprep.subr.bf16.mxu1 %v945_v32 }
  0xba   :  { %v162_v20 = vmul.f32 0.03125, %v89_v38  ;;  %v240_v36 = vmul.f32 %v1406_v33, %v1406_v33  ;;  %907 = vmatpush3.bf16.msra.mxu0 %v945_v32  ;;  %943 = vmatpush3.bf16.msra.mxu1 %v945_v32 }
  0xbb   :  { %v1415_v47 = vsub.f32 %v1215_v40, %v161_v42  ;;  %v319_v50 = vsel %vm53_vm0, %v239_v46, 0.0 }
  0xbc   :  { %v1418_v37 = vsub.f32 %v1220_v41, %v162_v20  ;;  %275 = vadd.xlane.f32.xlu1 %v274_v39  ;;  %320 = vadd.xlane.f32.xlu0 %v319_v50  ;;  %v134_v51 = vpop.xlane.xlu0 %133  ;;  %v322_v8 = vsel %vm53_vm0, %v240_v36, 0.0 }
  0xbd   :  { %v137_v54 = vpop.xlane.xlu1 %136  ;;  %v177_v58 = vmul.f32 0.03125, %v134_v51  ;;  %v225_v62 = vmul.f32 %v1415_v47, %v1415_v47 }
  0xbe   :  { %v178_v24 = vmul.f32 0.03125, %v137_v54  ;;  %v226_v40 = vmul.f32 %v1418_v37, %v1418_v37 }
  0xbf   :  { %v1427_v63 = vsub.f32 %v1229_v44, %v177_v58  ;;  %v277_v3 = vsel %vm53_vm0, %v225_v62, 0.0 }
  0xc0   :  { %v1430_v41 = vsub.f32 %v1234_v45, %v178_v24  ;;  %323 = vadd.xlane.f32.xlu1 %v322_v8  ;;  %278 = vadd.xlane.f32.xlu0 %v277_v3  ;;  %v92_v4 = vpop.xlane.xlu0 %91  ;;  %v280_v12 = vsel %vm53_vm0, %v226_v40, 0.0 }
  0xc1   :  { %v95_v6 = vpop.xlane.xlu1 %94  ;;  %v163_v28 = vmul.f32 0.03125, %v92_v4  ;;  %v241_v44 = vmul.f32 %v1427_v63, %v1427_v63 }
  0xc2   :  { %v164_v18 = vmul.f32 0.03125, %v95_v6  ;;  %v242_v45 = vmul.f32 %v1430_v41, %v1430_v41 }
  0xc3   :  { %v1442_v19 = vsub.f32 %v1243_v48, %v163_v28  ;;  %v325_v23 = vsel %vm53_vm0, %v241_v44, 0.0 }
  0xc4   :  { %v1445_v22 = vsub.f32 %v1248_v49, %v164_v18  ;;  %281 = vadd.xlane.f32.xlu1 %v280_v12  ;;  %326 = vadd.xlane.f32.xlu0 %v325_v23  ;;  %v140_v0 = vpop.xlane.xlu0 %139  ;;  %v328_v30 = vsel %vm53_vm0, %v242_v45, 0.0 }
  0xc5   :  { %v143_v16 = vpop.xlane.xlu1 %142  ;;  %v179_v34 = vmul.f32 0.03125, %v140_v0  ;;  %v227_v49 = vmul.f32 %v1442_v19, %v1442_v19 }
  0xc6   :  { %v180_v48 = vmul.f32 0.03125, %v143_v16  ;;  %v228_v35 = vmul.f32 %v1445_v22, %v1445_v22 }
  0xc7   :  { %v1457_v38 = vsub.f32 %v1257_v52, %v179_v34  ;;  %v283_v42 = vsel %vm53_vm0, %v227_v49, 0.0 }
  0xc8   :  { %v1460_v39 = vsub.f32 %v1262_v53, %v180_v48  ;;  %329 = vadd.xlane.f32.xlu1 %v328_v30  ;;  %284 = vadd.xlane.f32.xlu0 %v283_v42  ;;  %v98_v20 = vpop.xlane.xlu0 %97  ;;  %v286_v36 = vsel %vm53_vm0, %v228_v35, 0.0 }
  0xc9   :  { %v101_v46 = vpop.xlane.xlu1 %100  ;;  %v165_v50 = vmul.f32 0.03125, %v98_v20  ;;  %v243_v54 = vmul.f32 %v1457_v38, %v1457_v38 }
  0xca   :  { %v166_v51 = vmul.f32 0.03125, %v101_v46  ;;  %v244_v52 = vmul.f32 %v1460_v39, %v1460_v39 }
  0xcb   :  { %v1469_v53 = vsub.f32 %v1271_v56, %v165_v50  ;;  %v331_v58 = vsel %vm53_vm0, %v243_v54, 0.0 }
  0xcc   :  { %v1472_v8 = vsub.f32 %v1276_v57, %v166_v51  ;;  %287 = vadd.xlane.f32.xlu1 %v286_v36  ;;  %332 = vadd.xlane.f32.xlu0 %v331_v58  ;;  %v146_v24 = vpop.xlane.xlu0 %145  ;;  %v334_v40 = vsel %vm53_vm0, %v244_v52, 0.0 }
  0xcd   :  { %v149_v62 = vpop.xlane.xlu1 %148  ;;  %v181_v3 = vmul.f32 0.03125, %v146_v24  ;;  %v229_v6 = vmul.f32 %v1469_v53, %v1469_v53 }
  0xce   :  { %v182_v4 = vmul.f32 0.03125, %v149_v62  ;;  %v230_v56 = vmul.f32 %v1472_v8, %v1472_v8 }
  0xcf   :  { %v1481_v12 = vsub.f32 %v1285_v60, %v181_v3  ;;  %v289_v14 = vsel %vm53_vm0, %v229_v6, 0.0 }
  0xd0   :  { %v1484_v57 = vsub.f32 %v1290_v61, %v182_v4  ;;  %335 = vadd.xlane.f32.xlu1 %v334_v40  ;;  %290 = vadd.xlane.f32.xlu0 %v289_v14  ;;  %v292_v28 = vsel %vm53_vm0, %v230_v56, 0.0 }
  0xd1   :  { %v245_v18 = vmul.f32 %v1481_v12, %v1481_v12 }
  0xd2   :  { %v246_v44 = vmul.f32 %v1484_v57, %v1484_v57 }
  0xd3   :  { %v337_v45 = vsel %vm53_vm0, %v245_v18, 0.0 }
  0xd4   :  { %293 = vadd.xlane.f32.xlu1 %v292_v28  ;;  %338 = vadd.xlane.f32.xlu0 %v337_v45  ;;  %v340_v60 = vsel %vm53_vm0, %v246_v44, 0.0  ;;  %v1498_v28 = vld [vmem:[%s1879_s1] ss:$0 sm:$0xff] }
  0xd8   :  { %341 = vadd.xlane.f32.xlu1 %v340_v60 }
 0x125   :  { %v249_v61 = vpop.xlane.xlu0 %248 }
 0x126   :  { %v343_v23 = vmul.f32 0.03125, %v249_v61 }
 0x128   :  { %v375_v0 = vadd.f32 1e-05, %v343_v23 }
 0x129   :  { %v252_v16 = vpop.xlane.xlu1 %251  ;;  %v297_v30 = vpop.xlane.xlu0 %296 }
 0x12a   :  { %946 = vrsqrt.f32 %v375_v0  ;;  %v344_v32 = vmul.f32 0.03125, %v252_v16  ;;  %v359_v34 = vmul.f32 0.03125, %v297_v30 }
 0x12c   :  { %v376_v48 = vadd.f32 1e-05, %v344_v32  ;;  %v391_v49 = vadd.f32 1e-05, %v359_v34  ;;  %v1505_v32 = vld [vmem:[%s1880_s2] ss:$0 sm:$0xff] }
 0x12d   :  { %v300_v35 = vpop.xlane.xlu1 %299  ;;  %v255_v42 = vpop.xlane.xlu0 %254 }
 0x12e   :  { %948 = vrsqrt.f32 %v376_v48  ;;  %v360_v20 = vmul.f32 0.03125, %v300_v35  ;;  %v345_v46 = vmul.f32 0.03125, %v255_v42 }
 0x12f   :  { %950 = vrsqrt.f32 %v391_v49 }
 0x130   :  { %v392_v36 = vadd.f32 1e-05, %v360_v20  ;;  %v377_v50 = vadd.f32 1e-05, %v345_v46 }
 0x131   :  { %v258_v51 = vpop.xlane.xlu1 %257  ;;  %v303_v54 = vpop.xlane.xlu0 %302 }
 0x132   :  { %952 = vrsqrt.f32 %v392_v36  ;;  %v346_v52 = vmul.f32 0.03125, %v258_v51  ;;  %v361_v58 = vmul.f32 0.03125, %v303_v54 }
 0x133   :  { %954 = vrsqrt.f32 %v377_v50 }
 0x134   :  { %v947_v24 = vpop.eup %946  ;;  %v378_v62 = vadd.f32 1e-05, %v346_v52  ;;  %v393_v40 = vadd.f32 1e-05, %v361_v58 }
 0x135   :  { %v306_v3 = vpop.xlane.xlu1 %305  ;;  %v261_v4 = vpop.xlane.xlu0 %260  ;;  %v439_v6 = vmul.f32 %v947_v24, %v1297_v10 }
 0x136   :  { %956 = vrsqrt.f32 %v378_v62  ;;  %v362_v56 = vmul.f32 0.03125, %v306_v3  ;;  %v347_v14 = vmul.f32 0.03125, %v261_v4 }
 0x137   :  { %958 = vrsqrt.f32 %v393_v40  ;;  %v478_v16 = vmul.f32 %v1498_v28, %v439_v6 }
 0x138   :  { %v949_v18 = vpop.eup %948  ;;  %v394_v44 = vadd.f32 1e-05, %v362_v56  ;;  %v379_v45 = vadd.f32 1e-05, %v347_v14 }
 0x139   :  { %v951_v60 = vpop.eup %950  ;;  %v264_v61 = vpop.xlane.xlu1 %263  ;;  %v440_v0 = vmul.f32 %v949_v18, %v1307_v26  ;;  %v517_v36 = vadd.f32 %v1505_v32, %v478_v16 }
 0x13a   :  { %v309_v23 = vpop.xlane.xlu0 %308  ;;  %960 = vrsqrt.f32 %v394_v44  ;;  %v348_v10 = vmul.f32 0.03125, %v264_v61  ;;  %v455_v34 = vmul.f32 %v951_v60, %v1300_v11 }
 0x13b   :  { %v363_v30 = vmul.f32 0.03125, %v309_v23  ;;  %962 = vrsqrt.f32 %v379_v45  ;;  %v479_v48 = vmul.f32 %v1498_v28, %v440_v0 }
 0x13c   :  { %v953_v49 = vpop.eup %952  ;;  %v380_v35 = vadd.f32 1e-05, %v348_v10  ;;  %v494_v54 = vmul.f32 %v1498_v28, %v455_v34 }
 0x13d   :  { %v395_v42 = vadd.f32 1e-05, %v363_v30  ;;  %v955_v20 = vpop.eup %954  ;;  %v312_v26 = vpop.xlane.xlu1 %311  ;;  %v518_v50 = vadd.f32 %v1505_v32, %v479_v48  ;;  %v456_v51 = vmul.f32 %v953_v49, %v1310_v27 }
 0x13e   :  { %v267_v46 = vpop.xlane.xlu0 %266  ;;  %v441_v52 = vmul.f32 %v955_v20, %v1319_v2  ;;  %964 = vrsqrt.f32 %v380_v35  ;;  %v364_v11 = vmul.f32 0.03125, %v312_v26  ;;  %v533_v18 = vadd.f32 %v1505_v32, %v494_v54 }
 0x13f   :  { %v349_v58 = vmul.f32 0.03125, %v267_v46  ;;  %966 = vrsqrt.f32 %v395_v42  ;;  %v549_v24 = vpack.c.bf16 %v518_v50, %v517_v36  ;;  %v495_v62 = vmul.f32 %v1498_v28, %v456_v51 }
 0x140   :  { %v957_v40 = vpop.eup %956  ;;  %v396_v3 = vadd.f32 1e-05, %v364_v11  ;;  %v480_v44 = vmul.f32 %v1498_v28, %v441_v52 }
 0x141   :  { %v381_v4 = vadd.f32 1e-05, %v349_v58  ;;  %v959_v6 = vpop.eup %958  ;;  %v442_v56 = vmul.f32 %v957_v40, %v1322_v5  ;;  %v270_v14 = vpop.xlane.xlu1 %269  ;;  %908 = vmatprep.mubr.msk.bf16.mxu0 %vm53_vm0, %v549_v24  ;;  %v534_v2 = vadd.f32 %v1505_v32, %v495_v62 }
 0x142   :  { %v315_v27 = vpop.xlane.xlu0 %314  ;;  %v457_v45 = vmul.f32 %v959_v6, %v1331_v55  ;;  %968 = vrsqrt.f32 %v396_v3  ;;  %v350_v60 = vmul.f32 0.03125, %v270_v14  ;;  %v519_v35 = vadd.f32 %v1505_v32, %v480_v44 }
 0x143   :  { %v365_v61 = vmul.f32 0.03125, %v315_v27  ;;  %970 = vrsqrt.f32 %v381_v4  ;;  %v557_v23 = vpack.c.bf16 %v534_v2, %v533_v18  ;;  %v481_v0 = vmul.f32 %v1498_v28, %v442_v56 }
 0x144   :  { %v961_v5 = vpop.eup %960  ;;  %v382_v16 = vadd.f32 1e-05, %v350_v60  ;;  %v496_v42 = vmul.f32 %v1498_v28, %v457_v45 }
 0x145   :  { %v397_v10 = vadd.f32 1e-05, %v365_v61  ;;  %v963_v30 = vpop.eup %962  ;;  %v458_v34 = vmul.f32 %v961_v5, %v1334_v9  ;;  %v318_v48 = vpop.xlane.xlu1 %317  ;;  %924 = vmatprep.mubr.msk.bf16.mxu1 %vm53_vm0, %v557_v23  ;;  %v520_v55 = vadd.f32 %v1505_v32, %v481_v0 }
 0x146   :  { %v273_v49 = vpop.xlane.xlu0 %272  ;;  %v443_v20 = vmul.f32 %v963_v30, %v1343_v7  ;;  %972 = vrsqrt.f32 %v382_v16  ;;  %v366_v26 = vmul.f32 0.03125, %v318_v48  ;;  %v535_v62 = vadd.f32 %v1505_v32, %v496_v42 }
 0x147   :  { %v351_v46 = vmul.f32 0.03125, %v273_v49  ;;  %974 = vrsqrt.f32 %v397_v10  ;;  %v550_v36 = vpack.c.bf16 %v520_v55, %v519_v35  ;;  %v497_v50 = vmul.f32 %v1498_v28, %v458_v34 }
 0x148   :  { %v965_v9 = vpop.eup %964  ;;  %v398_v51 = vadd.f32 1e-05, %v366_v26  ;;  %v482_v40 = vmul.f32 %v1498_v28, %v443_v20 }
 0x149   :  { %v383_v54 = vadd.f32 1e-05, %v351_v46  ;;  %v967_v52 = vpop.eup %966  ;;  %v444_v11 = vmul.f32 %v965_v9, %v1346_v13  ;;  %v276_v58 = vpop.xlane.xlu1 %275  ;;  %909 = vmatmul.mubr.msk.bf16.vlgmr.msra.gmra.mrb[0].mxu0 %vm53_vm0, %v550_v36  ;;  %v536_v7 = vadd.f32 %v1505_v32, %v497_v50 }
 0x14a   :  { %v321_v24 = vpop.xlane.xlu0 %320  ;;  %v459_v3 = vmul.f32 %v967_v52, %v1355_v1  ;;  %976 = vrsqrt.f32 %v398_v51  ;;  %v352_v4 = vmul.f32 0.03125, %v276_v58  ;;  %v521_v61 = vadd.f32 %v1505_v32, %v482_v40 }
 0x14b   :  { %v367_v6 = vmul.f32 0.03125, %v321_v24  ;;  %978 = vrsqrt.f32 %v383_v54  ;;  %v558_v56 = vpack.c.bf16 %v536_v7, %v535_v62  ;;  %v483_v14 = vmul.f32 %v1498_v28, %v444_v11 }
 0x14c   :  { %v969_v13 = vpop.eup %968  ;;  %v384_v27 = vadd.f32 1e-05, %v352_v4  ;;  %v498_v23 = vmul.f32 %v1498_v28, %v459_v3 }
 0x14d   :  { %v399_v18 = vadd.f32 1e-05, %v367_v6  ;;  %v971_v2 = vpop.eup %970  ;;  %v460_v44 = vmul.f32 %v969_v13, %v1358_v17  ;;  %v324_v45 = vpop.xlane.xlu1 %323  ;;  %925 = vmatmul.mubr.msk.bf16.vlgmr.msra.gmra.mrb[0].mxu1 %vm53_vm0, %v558_v56  ;;  %v522_v1 = vadd.f32 %v1505_v32, %v483_v14 }
 0x14e   :  { %v279_v60 = vpop.xlane.xlu0 %278  ;;  %v445_v0 = vmul.f32 %v971_v2, %v1367_v43  ;;  %980 = vrsqrt.f32 %v384_v27  ;;  %v368_v5 = vmul.f32 0.03125, %v324_v45  ;;  %v537_v20 = vadd.f32 %v1505_v32, %v498_v23 }
 0x14f   :  { %v353_v16 = vmul.f32 0.03125, %v279_v60  ;;  %982 = vrsqrt.f32 %v399_v18  ;;  %v551_v10 = vpack.c.bf16 %v522_v1, %v521_v61  ;;  %v499_v30 = vmul.f32 %v1498_v28, %v460_v44 }
 0x150   :  { %v973_v17 = vpop.eup %972  ;;  %v400_v34 = vadd.f32 1e-05, %v368_v5  ;;  %v484_v26 = vmul.f32 %v1498_v28, %v445_v0 }
 0x151   :  { %v385_v48 = vadd.f32 1e-05, %v353_v16  ;;  %v975_v49 = vpop.eup %974  ;;  %v446_v35 = vmul.f32 %v973_v17, %v1370_v21  ;;  %v282_v55 = vpop.xlane.xlu1 %281  ;;  %912 = vmatprep.mubr.msk.bf16.mxu0 %vm53_vm0, %v551_v10  ;;  %v538_v43 = vadd.f32 %v1505_v32, %v499_v30 }
 0x152   :  { %v327_v42 = vpop.xlane.xlu0 %326  ;;  %v461_v46 = vmul.f32 %v975_v49, %v1379_v59  ;;  %984 = vrsqrt.f32 %v400_v34  ;;  %v354_v36 = vmul.f32 0.03125, %v282_v55  ;;  %v523_v7 = vadd.f32 %v1505_v32, %v484_v26 }
 0x153   :  { %v369_v50 = vmul.f32 0.03125, %v327_v42  ;;  %986 = vrsqrt.f32 %v385_v48  ;;  %v559_v9 = vpack.c.bf16 %v538_v43, %v537_v20  ;;  %v485_v51 = vmul.f32 %v1498_v28, %v446_v35 }
 0x154   :  { %v977_v21 = vpop.eup %976  ;;  %v386_v54 = vadd.f32 1e-05, %v354_v36  ;;  %v500_v40 = vmul.f32 %v1498_v28, %v461_v46 }
 0x155   :  { %v401_v52 = vadd.f32 1e-05, %v369_v50  ;;  %v979_v11 = vpop.eup %978  ;;  %v462_v58 = vmul.f32 %v977_v21, %v1382_v25  ;;  %v330_v24 = vpop.xlane.xlu1 %329  ;;  %928 = vmatprep.mubr.msk.bf16.mxu1 %vm53_vm0, %v559_v9  ;;  %v524_v59 = vadd.f32 %v1505_v32, %v485_v51 }
 0x156   :  { %v285_v62 = vpop.xlane.xlu0 %284  ;;  %v447_v3 = vmul.f32 %v979_v11, %v1391_v15  ;;  %988 = vrsqrt.f32 %v386_v54  ;;  %v370_v4 = vmul.f32 0.03125, %v330_v24  ;;  %v539_v60 = vadd.f32 %v1505_v32, %v500_v40 }
 0x157   :  { %v355_v6 = vmul.f32 0.03125, %v285_v62  ;;  %990 = vrsqrt.f32 %v401_v52  ;;  %v552_v56 = vpack.c.bf16 %v524_v59, %v523_v7  ;;  %v501_v14 = vmul.f32 %v1498_v28, %v462_v58 }
 0x158   :  { %v981_v25 = vpop.eup %980  ;;  %v402_v13 = vadd.f32 1e-05, %v370_v4  ;;  %v486_v61 = vmul.f32 %v1498_v28, %v447_v3 }
 0x159   :  { %v387_v27 = vadd.f32 1e-05, %v355_v6  ;;  %v983_v18 = vpop.eup %982  ;;  %v448_v2 = vmul.f32 %v981_v25, %v1394_v29  ;;  %v288_v44 = vpop.xlane.xlu1 %287  ;;  %913 = vmatmul.mubr.msk.bf16.gmra.mrb[4].mxu0 %vm53_vm0, %v552_v56  ;;  %v540_v15 = vadd.f32 %v1505_v32, %v501_v14 }
 0x15a   :  { %v333_v45 = vpop.xlane.xlu0 %332  ;;  %v463_v1 = vmul.f32 %v983_v18, %v1403_v31  ;;  %992 = vrsqrt.f32 %v402_v13  ;;  %v356_v23 = vmul.f32 0.03125, %v288_v44  ;;  %v525_v35 = vadd.f32 %v1505_v32, %v486_v61 }
 0x15b   :  { %v371_v0 = vmul.f32 0.03125, %v333_v45  ;;  %994 = vrsqrt.f32 %v387_v27  ;;  %v560_v5 = vpack.c.bf16 %v540_v15, %v539_v60  ;;  %v487_v16 = vmul.f32 %v1498_v28, %v448_v2 }
 0x15c   :  { %v985_v29 = vpop.eup %984  ;;  %v388_v10 = vadd.f32 1e-05, %v356_v23  ;;  %v502_v55 = vmul.f32 %v1498_v28, %v463_v1 }
 0x15d   :  { %v403_v30 = vadd.f32 1e-05, %v371_v0  ;;  %v987_v17 = vpop.eup %986  ;;  %v464_v34 = vmul.f32 %v985_v29, %v1406_v33  ;;  %v336_v48 = vpop.xlane.xlu1 %335  ;;  %929 = vmatmul.mubr.msk.bf16.gmra.mrb[4].mxu1 %vm53_vm0, %v560_v5  ;;  %v526_v31 = vadd.f32 %v1505_v32, %v487_v16 }
 0x15e   :  { %v291_v49 = vpop.xlane.xlu0 %290  ;;  %v449_v42 = vmul.f32 %v987_v17, %v1415_v47  ;;  %996 = vrsqrt.f32 %v388_v10  ;;  %v372_v20 = vmul.f32 0.03125, %v336_v48  ;;  %v541_v52 = vadd.f32 %v1505_v32, %v502_v55 }
 0x15f   :  { %v357_v43 = vmul.f32 0.03125, %v291_v49  ;;  %998 = vrsqrt.f32 %v403_v30  ;;  %v553_v26 = vpack.c.bf16 %v526_v31, %v525_v35  ;;  %v503_v46 = vmul.f32 %v1498_v28, %v464_v34 }
 0x160   :  { %v989_v33 = vpop.eup %988  ;;  %v404_v36 = vadd.f32 1e-05, %v372_v20  ;;  %v488_v11 = vmul.f32 %v1498_v28, %v449_v42 }
 0x161   :  { %v389_v50 = vadd.f32 1e-05, %v357_v43  ;;  %v991_v9 = vpop.eup %990  ;;  %v450_v51 = vmul.f32 %v989_v33, %v1418_v37  ;;  %v294_v21 = vpop.xlane.xlu1 %293  ;;  %916 = vmatprep.mubr.msk.bf16.mxu0 %vm53_vm0, %v553_v26  ;;  %v542_v47 = vadd.f32 %v1505_v32, %v503_v46 }
 0x162   :  { %v339_v54 = vpop.xlane.xlu0 %338  ;;  %v465_v58 = vmul.f32 %v991_v9, %v1427_v63  ;;  %1000 = vrsqrt.f32 %v404_v36  ;;  %v358_v24 = vmul.f32 0.03125, %v294_v21  ;;  %v527_v14 = vadd.f32 %v1505_v32, %v488_v11  ;;  %v1010_v11 = vld [vmem:[%s1877_s0 + $0x10] sm:$0xff] }
 0x163   :  { %v373_v62 = vmul.f32 0.03125, %v339_v54  ;;  %1002 = vrsqrt.f32 %v389_v50  ;;  %v561_v7 = vpack.c.bf16 %v542_v47, %v541_v52  ;;  %v489_v59 = vmul.f32 %v1498_v28, %v450_v51 }
 0x164   :  { %v993_v37 = vpop.eup %992  ;;  %v390_v40 = vadd.f32 1e-05, %v358_v24  ;;  %v504_v25 = vmul.f32 %v1498_v28, %v465_v58 }
 0x165   :  { %v405_v3 = vadd.f32 1e-05, %v373_v62  ;;  %v995_v4 = vpop.eup %994  ;;  %v466_v6 = vmul.f32 %v993_v37, %v1430_v41  ;;  %v342_v56 = vpop.xlane.xlu1 %341  ;;  %932 = vmatprep.mubr.msk.bf16.mxu1 %vm53_vm0, %v561_v7  ;;  %v528_v63 = vadd.f32 %v1505_v32, %v489_v59  ;;  %v1011_v62 = vld [vmem:[%s1877_s0] sm:$0xff] }
 0x166   :  { %v451_v13 = vmul.f32 %v995_v4, %v1442_v19  ;;  %1004 = vrsqrt.f32 %v390_v40  ;;  %v374_v27 = vmul.f32 0.03125, %v342_v56  ;;  %v543_v15 = vadd.f32 %v1505_v32, %v504_v25  ;;  %v1012_v40 = vld [vmem:[%s1877_s0 + $0x18] sm:$0xff]  ;;  %v1013_v56 = vld [vmem:[%s1877_s0 + $0x8] sm:$0xff] }
 0x167   :  { %1006 = vrsqrt.f32 %v405_v3  ;;  %v554_v18 = vpack.c.bf16 %v528_v63, %v527_v14  ;;  %v505_v2 = vmul.f32 %v1498_v28, %v466_v6 }
 0x168   :  { %v997_v44 = vpop.eup %996  ;;  %v406_v45 = vadd.f32 1e-05, %v374_v27  ;;  %v490_v1 = vmul.f32 %v1498_v28, %v451_v13  ;;  %v1014_v13 = vld [vmem:[%s1877_s0 + $0x90] sm:$0xff] }
 0x169   :  { %v999_v41 = vpop.eup %998  ;;  %v452_v60 = vmul.f32 %v997_v44, %v1445_v22  ;;  %917 = vmatmul.mubr.msk.bf16.gmra.mrb[8].mxu0 %vm53_vm0, %v554_v18  ;;  %v544_v61 = vadd.f32 %v1505_v32, %v505_v2  ;;  %v1015_v44 = vld [vmem:[%s1877_s0 + $0x80] sm:$0xff] }
 0x16a   :  { %v467_v19 = vmul.f32 %v999_v41, %v1457_v38  ;;  %1008 = vrsqrt.f32 %v406_v45  ;;  %v529_v22 = vadd.f32 %v1505_v32, %v490_v1 }
 0x16b   :  { %v562_v23 = vpack.c.bf16 %v544_v61, %v543_v15  ;;  %v491_v0 = vmul.f32 %v1498_v28, %v452_v60  ;;  %v1016_v60 = vld [vmem:[%s1877_s0 + $0x98] sm:$0xff]  ;;  %v1017_v61 = vld [vmem:[%s1877_s0 + $0x88] sm:$0xff] }
 0x16c   :  { %v1001_v5 = vpop.eup %1000  ;;  %v506_v30 = vmul.f32 %v1498_v28, %v467_v19 }
 0x16d   :  { %v1003_v16 = vpop.eup %1002  ;;  %v468_v29 = vmul.f32 %v1001_v5, %v1460_v39  ;;  %933 = vmatmul.mubr.msk.bf16.gmra.mrb[8].mxu1 %vm53_vm0, %v562_v23  ;;  %v530_v10 = vadd.f32 %v1505_v32, %v491_v0 }
 0x16e   :  { %v453_v17 = vmul.f32 %v1003_v16, %v1469_v53  ;;  %v545_v39 = vadd.f32 %v1505_v32, %v506_v30 }
 0x16f   :  { %v555_v34 = vpack.c.bf16 %v530_v10, %v529_v22  ;;  %v507_v38 = vmul.f32 %v1498_v28, %v468_v29  ;;  %v1018_v29 = vld [vmem:[%s1877_s0 + $0x30] sm:$0xff] }
 0x170   :  { %v1005_v48 = vpop.eup %1004  ;;  %v492_v55 = vmul.f32 %v1498_v28, %v453_v17  ;;  %v1019_v17 = vld [vmem:[%s1877_s0 + $0x20] sm:$0xff] }
 0x171   :  { %v1007_v49 = vpop.eup %1006  ;;  %v454_v35 = vmul.f32 %v1005_v48, %v1472_v8  ;;  %920 = vmatprep.mubr.msk.bf16.mxu0 %vm53_vm0, %v555_v34  ;;  %v546_v31 = vadd.f32 %v1505_v32, %v507_v38 }
 0x172   :  { %v469_v42 = vmul.f32 %v1007_v49, %v1481_v12  ;;  %v531_v8 = vadd.f32 %v1505_v32, %v492_v55  ;;  %v1020_v49 = vld [vmem:[%s1877_s0 + $0x38] sm:$0xff]  ;;  %v1021_v55 = vld [vmem:[%s1877_s0 + $0x28] sm:$0xff] }
 0x173   :  { %v563_v20 = vpack.c.bf16 %v546_v31, %v545_v39  ;;  %v493_v53 = vmul.f32 %v1498_v28, %v454_v35 }
 0x174   :  { %v1009_v43 = vpop.eup %1008  ;;  %v508_v33 = vmul.f32 %v1498_v28, %v469_v42 }
 0x175   :  { %v470_v26 = vmul.f32 %v1009_v43, %v1484_v57  ;;  %936 = vmatprep.mubr.msk.bf16.mxu1 %vm53_vm0, %v563_v20  ;;  %v532_v46 = vadd.f32 %v1505_v32, %v493_v53  ;;  %v1619_v57 = vld [vmem:[%s1881_s4] ss:$0 sm:$0xff]  ;;  %v1022_v43 = vld [vmem:[%s1877_s0 + $0xb0] sm:$0xff] }
 0x176   :  { %v547_v12 = vadd.f32 %v1505_v32, %v508_v33  ;;  %v1023_v33 = vld [vmem:[%s1877_s0 + $0xa0] sm:$0xff] }
 0x177   :  { %v556_v36 = vpack.c.bf16 %v532_v46, %v531_v8  ;;  %v509_v50 = vmul.f32 %v1498_v28, %v470_v26 }
 0x179   :  { %921 = vmatmul.mubr.msk.bf16.gmra.mrb[12].mxu0 %vm53_vm0, %v556_v36  ;;  %v548_v9 = vadd.f32 %v1505_v32, %v509_v50 }
 0x17b   :  { %v564_v51 = vpack.c.bf16 %v548_v9, %v547_v12  ;;  %v1024_v12 = vld [vmem:[%s1877_s0 + $0xb8] sm:$0xff] }
 0x17d   :  { %937 = vmatmul.mubr.msk.bf16.gmra.mrb[12].mxu1 %vm53_vm0, %v564_v51  ;;  %v1025_v51 = vld [vmem:[%s1877_s0 + $0xa8] sm:$0xff] }
 0x21c   :  { %v910_v21 = vpop.f32.mrb[0].mxu0 }
 0x21d   :  { %v679_v54 = vadd.f32 %v910_v21, %v1619_v57  ;;  %v670_v52 = vpop.f32.mrb[1].mxu0 }
 0x21e   :  { %v671_v28 = vadd.f32 %v1619_v57, %v670_v52  ;;  %v911_v47 = vpop.f32.mrb[2].mxu0 }
 0x21f   :  { %v799_v32 = vadd.f32 %v1010_v11, %v679_v54  ;;  %v682_v58 = vadd.f32 %v911_v47, %v1619_v57  ;;  %v673_v24 = vpop.f32.mrb[3].mxu0 }
 0x220   :  { %v797_v7 = vadd.f32 %v1011_v62, %v671_v28  ;;  %v674_v59 = vadd.f32 %v1619_v57, %v673_v24  ;;  %v926_v37 = vpop.f32.mrb[0].mxu1 }
 0x221   :  { %831 = vst.msk [vmem:[%s1882_s5 + $0x10] sm:$0xff] %vm53_vm0, %v799_v32  ;;  %v800_v3 = vadd.f32 %v1012_v40, %v682_v58  ;;  %v743_v4 = vadd.f32 %v926_v37, %v1619_v57  ;;  %v734_v6 = vpop.f32.mrb[1].mxu1  ;;  %v1026_v32 = vld [vmem:[%s1877_s0 + $0x50] sm:$0xff] }
 0x222   :  { %829 = vst.msk [vmem:[%s1882_s5] sm:$0xff] %vm53_vm0, %v797_v7  ;;  %v798_v14 = vadd.f32 %v1013_v56, %v674_v59  ;;  %v735_v63 = vadd.f32 %v1619_v57, %v734_v6  ;;  %v927_v25 = vpop.f32.mrb[2].mxu1  ;;  %v1027_v7 = vld [vmem:[%s1877_s0 + $0x40] sm:$0xff] }
 0x223   :  { %832 = vst.msk [vmem:[%s1882_s5 + $0x18] sm:$0xff] %vm53_vm0, %v800_v3  ;;  %v815_v27 = vadd.f32 %v1014_v13, %v743_v4  ;;  %v746_v18 = vadd.f32 %v927_v25, %v1619_v57  ;;  %v737_v2 = vpop.f32.mrb[3].mxu1  ;;  %v1028_v3 = vld [vmem:[%s1877_s0 + $0x58] sm:$0xff] }
 0x224   :  { %830 = vst.msk [vmem:[%s1882_s5 + $0x8] sm:$0xff] %vm53_vm0, %v798_v14  ;;  %v813_v45 = vadd.f32 %v1015_v44, %v735_v63  ;;  %v738_v41 = vadd.f32 %v1619_v57, %v737_v2  ;;  %v1029_v14 = vld [vmem:[%s1877_s0 + $0x48] sm:$0xff] }
 0x225   :  { %847 = vst.msk [vmem:[%s1882_s5 + $0x90] sm:$0xff] %vm53_vm0, %v815_v27  ;;  %v816_v15 = vadd.f32 %v1016_v60, %v746_v18  ;;  %v1030_v27 = vld [vmem:[%s1877_s0 + $0xd0] sm:$0xff] }
 0x226   :  { %845 = vst.msk [vmem:[%s1882_s5 + $0x80] sm:$0xff] %vm53_vm0, %v813_v45  ;;  %v814_v1 = vadd.f32 %v1017_v61, %v738_v41  ;;  %v1031_v45 = vld [vmem:[%s1877_s0 + $0xc0] sm:$0xff] }
 0x227   :  { %848 = vst.msk [vmem:[%s1882_s5 + $0x98] sm:$0xff] %vm53_vm0, %v816_v15  ;;  %v1032_v15 = vld [vmem:[%s1877_s0 + $0xd8] sm:$0xff] }
 0x228   :  { %846 = vst.msk [vmem:[%s1882_s5 + $0x88] sm:$0xff] %vm53_vm0, %v814_v1  ;;  %v1033_v1 = vld [vmem:[%s1877_s0 + $0xc8] sm:$0xff] }
 0x22c   :  { %v914_v19 = vpop.f32.mrb[4].mxu0 }
 0x22d   :  { %v695_v23 = vadd.f32 %v914_v19, %v1619_v57  ;;  %v686_v0 = vpop.f32.mrb[5].mxu0 }
 0x22e   :  { %v687_v5 = vadd.f32 %v1619_v57, %v686_v0  ;;  %v915_v16 = vpop.f32.mrb[6].mxu0 }
 0x22f   :  { %v803_v22 = vadd.f32 %v1018_v29, %v695_v23  ;;  %v698_v10 = vadd.f32 %v915_v16, %v1619_v57  ;;  %v689_v30 = vpop.f32.mrb[7].mxu0 }
 0x230   :  { %v801_v34 = vadd.f32 %v1019_v17, %v687_v5  ;;  %v690_v38 = vadd.f32 %v1619_v57, %v689_v30  ;;  %v930_v48 = vpop.f32.mrb[4].mxu1 }
 0x231   :  { %835 = vst.msk [vmem:[%s1882_s5 + $0x30] sm:$0xff] %vm53_vm0, %v803_v22  ;;  %v804_v35 = vadd.f32 %v1020_v49, %v698_v10  ;;  %v759_v39 = vadd.f32 %v930_v48, %v1619_v57  ;;  %v750_v31 = vpop.f32.mrb[5].mxu1  ;;  %v1034_v22 = vld [vmem:[%s1877_s0 + $0x70] sm:$0xff] }
 0x232   :  { %833 = vst.msk [vmem:[%s1882_s5 + $0x20] sm:$0xff] %vm53_vm0, %v801_v34  ;;  %v802_v42 = vadd.f32 %v1021_v55, %v690_v38  ;;  %v751_v20 = vadd.f32 %v1619_v57, %v750_v31  ;;  %v931_v53 = vpop.f32.mrb[6].mxu1  ;;  %v1035_v34 = vld [vmem:[%s1877_s0 + $0x60] sm:$0xff] }
 0x233   :  { %836 = vst.msk [vmem:[%s1882_s5 + $0x38] sm:$0xff] %vm53_vm0, %v804_v35  ;;  %v819_v26 = vadd.f32 %v1022_v43, %v759_v39  ;;  %v762_v8 = vadd.f32 %v931_v53, %v1619_v57  ;;  %v753_v46 = vpop.f32.mrb[7].mxu1  ;;  %v1036_v35 = vld [vmem:[%s1877_s0 + $0x78] sm:$0xff] }
 0x234   :  { %834 = vst.msk [vmem:[%s1882_s5 + $0x28] sm:$0xff] %vm53_vm0, %v802_v42  ;;  %v817_v36 = vadd.f32 %v1023_v33, %v751_v20  ;;  %v754_v50 = vadd.f32 %v1619_v57, %v753_v46  ;;  %v1037_v42 = vld [vmem:[%s1877_s0 + $0x68] sm:$0xff] }
 0x235   :  { %851 = vst.msk [vmem:[%s1882_s5 + $0xb0] sm:$0xff] %vm53_vm0, %v819_v26  ;;  %v820_v9 = vadd.f32 %v1024_v12, %v762_v8  ;;  %v1038_v26 = vld [vmem:[%s1877_s0 + $0xf0] sm:$0xff] }
 0x236   :  { %849 = vst.msk [vmem:[%s1882_s5 + $0xa0] sm:$0xff] %vm53_vm0, %v817_v36  ;;  %v818_v21 = vadd.f32 %v1025_v51, %v754_v50  ;;  %v1039_v36 = vld [vmem:[%s1877_s0 + $0xe0] sm:$0xff] }
 0x237   :  { %852 = vst.msk [vmem:[%s1882_s5 + $0xb8] sm:$0xff] %vm53_vm0, %v820_v9  ;;  %v1040_v9 = vld [vmem:[%s1877_s0 + $0xf8] sm:$0xff] }
 0x238   :  { %850 = vst.msk [vmem:[%s1882_s5 + $0xa8] sm:$0xff] %vm53_vm0, %v818_v21  ;;  %v1041_v21 = vld [vmem:[%s1877_s0 + $0xe8] sm:$0xff] }
 0x23c   :  { %v918_v54 = vpop.f32.mrb[8].mxu0 }
 0x23d   :  { %v711_v52 = vadd.f32 %v918_v54, %v1619_v57  ;;  %v702_v28 = vpop.f32.mrb[9].mxu0 }
 0x23e   :  { %v703_v47 = vadd.f32 %v1619_v57, %v702_v28  ;;  %v919_v11 = vpop.f32.mrb[10].mxu0 }
 0x23f   :  { %v807_v58 = vadd.f32 %v1026_v32, %v711_v52  ;;  %v714_v24 = vadd.f32 %v919_v11, %v1619_v57  ;;  %v705_v62 = vpop.f32.mrb[11].mxu0 }
 0x240   :  { %v805_v59 = vadd.f32 %v1027_v7, %v703_v47  ;;  %v706_v37 = vadd.f32 %v1619_v57, %v705_v62  ;;  %v934_v40 = vpop.f32.mrb[8].mxu1 }
 0x241   :  { %839 = vst.msk [vmem:[%s1882_s5 + $0x50] sm:$0xff] %vm53_vm0, %v807_v58  ;;  %v808_v4 = vadd.f32 %v1028_v3, %v714_v24  ;;  %v775_v6 = vadd.f32 %v934_v40, %v1619_v57  ;;  %v766_v56 = vpop.f32.mrb[9].mxu1 }
 0x242   :  { %837 = vst.msk [vmem:[%s1882_s5 + $0x40] sm:$0xff] %vm53_vm0, %v805_v59  ;;  %v806_v63 = vadd.f32 %v1029_v14, %v706_v37  ;;  %v767_v25 = vadd.f32 %v1619_v57, %v766_v56  ;;  %v935_v13 = vpop.f32.mrb[10].mxu1 }
 0x243   :  { %840 = vst.msk [vmem:[%s1882_s5 + $0x58] sm:$0xff] %vm53_vm0, %v808_v4  ;;  %v823_v18 = vadd.f32 %v1030_v27, %v775_v6  ;;  %v778_v2 = vadd.f32 %v935_v13, %v1619_v57  ;;  %v769_v44 = vpop.f32.mrb[11].mxu1 }
 0x244   :  { %838 = vst.msk [vmem:[%s1882_s5 + $0x48] sm:$0xff] %vm53_vm0, %v806_v63  ;;  %v821_v41 = vadd.f32 %v1031_v45, %v767_v25  ;;  %v770_v60 = vadd.f32 %v1619_v57, %v769_v44 }
 0x245   :  { %855 = vst.msk [vmem:[%s1882_s5 + $0xd0] sm:$0xff] %vm53_vm0, %v823_v18  ;;  %v824_v61 = vadd.f32 %v1032_v15, %v778_v2 }
 0x246   :  { %853 = vst.msk [vmem:[%s1882_s5 + $0xc0] sm:$0xff] %vm53_vm0, %v821_v41  ;;  %v822_v19 = vadd.f32 %v1033_v1, %v770_v60 }
 0x247   :  { %856 = vst.msk [vmem:[%s1882_s5 + $0xd8] sm:$0xff] %vm53_vm0, %v824_v61 }
 0x248   :  { %854 = vst.msk [vmem:[%s1882_s5 + $0xc8] sm:$0xff] %vm53_vm0, %v822_v19 }
 0x24c   :  { %v922_v23 = vpop.f32.mrb[12].mxu0 }
 0x24d   :  { %v727_v0 = vadd.f32 %v922_v23, %v1619_v57  ;;  %v718_v5 = vpop.f32.mrb[13].mxu0 }
 0x24e   :  { %v719_v16 = vadd.f32 %v1619_v57, %v718_v5  ;;  %v923_v29 = vpop.f32.mrb[14].mxu0 }
 0x24f   :  { %v811_v10 = vadd.f32 %v1034_v22, %v727_v0  ;;  %v730_v30 = vadd.f32 %v923_v29, %v1619_v57  ;;  %v721_v17 = vpop.f32.mrb[15].mxu0 }
 0x250   :  { %v809_v38 = vadd.f32 %v1035_v34, %v719_v16  ;;  %v722_v48 = vadd.f32 %v1619_v57, %v721_v17  ;;  %v938_v49 = vpop.f32.mrb[12].mxu1 }
 0x251   :  { %843 = vst.msk [vmem:[%s1882_s5 + $0x70] sm:$0xff] %vm53_vm0, %v811_v10  ;;  %v812_v39 = vadd.f32 %v1036_v35, %v730_v30  ;;  %v791_v31 = vadd.f32 %v938_v49, %v1619_v57  ;;  %v782_v55 = vpop.f32.mrb[13].mxu1 }
 0x252   :  { %841 = vst.msk [vmem:[%s1882_s5 + $0x60] sm:$0xff] %vm53_vm0, %v809_v38  ;;  %v810_v20 = vadd.f32 %v1037_v42, %v722_v48  ;;  %v783_v53 = vadd.f32 %v1619_v57, %v782_v55  ;;  %v939_v43 = vpop.f32.mrb[14].mxu1 }
 0x253   :  { %844 = vst.msk [vmem:[%s1882_s5 + $0x78] sm:$0xff] %vm53_vm0, %v812_v39  ;;  %v827_v8 = vadd.f32 %v1038_v26, %v791_v31  ;;  %v794_v46 = vadd.f32 %v939_v43, %v1619_v57  ;;  %v785_v33 = vpop.f32.mrb[15].mxu1 }
 0x254   :  { %842 = vst.msk [vmem:[%s1882_s5 + $0x68] sm:$0xff] %vm53_vm0, %v810_v20  ;;  %v825_v50 = vadd.f32 %v1039_v36, %v783_v53  ;;  %v786_v12 = vadd.f32 %v1619_v57, %v785_v33 }
 0x255   :  { %859 = vst.msk [vmem:[%s1882_s5 + $0xf0] sm:$0xff] %vm53_vm0, %v827_v8  ;;  %v828_v51 = vadd.f32 %v1040_v9, %v794_v46 }
 0x256   :  { %857 = vst.msk [vmem:[%s1882_s5 + $0xe0] sm:$0xff] %vm53_vm0, %v825_v50  ;;  %v826_v57 = vadd.f32 %v1041_v21, %v786_v12 }
 0x257   :  { %860 = vst.msk [vmem:[%s1882_s5 + $0xf8] sm:$0xff] %vm53_vm0, %v828_v51 }
 0x258   :  { %858 = vst.msk [vmem:[%s1882_s5 + $0xe8] sm:$0xff] %vm53_vm0, %v826_v57 }

</bundles_post_ra>
